<compile_context>
chip_gen: v7x
topology: tpu7x:2x2x1
jax: 0.10.0
libtpu: 0.0.40
codegen_flags: <defaults>
</compile_context>

<pallas_src>
import functools

import jax
import jax.numpy as jnp
from jax.experimental import pallas as pl
from jax.experimental.pallas import tpu as pltpu

_LANE = 128
_SUBLANE = 8


def _round_up(n, m):
    return ((n + m - 1) // m) * m


def _pad2d(a, rows, cols):
    pr, pc = rows - a.shape[0], cols - a.shape[1]
    if pr or pc:
        a = jnp.pad(a, ((0, pr), (0, pc)))
    return a


def _packed_sublane(dtype):
    # Sub-32-bit dtypes pack 2/4 rows per sublane; align batch tiles to that granularity.
    return _SUBLANE * max(1, 4 // jnp.dtype(dtype).itemsize)


def _vmem_cap_bytes():
    """Generation-aware vmem_limit cap (leave headroom for Mosaic internal scratch)."""
    cap = 64 << 20
    try:
        cap = int(pltpu.get_tpu_info().vmem_capacity_bytes)
    except Exception:
        pass
    if cap <= (64 << 20):                            # v7x-class: 64 MiB / TensorCore
        return max(cap - (12 << 20), 16 << 20)
    return min(cap - (28 << 20), 100 << 20)          # v5e / v6e: 128 MiB


def _resident_spec(shape, index_map):
    """BlockSpec for operands whose block never changes: single-buffered (DMA'd once)."""
    try:
        return pl.BlockSpec(shape, index_map, pipeline_mode=pl.Buffered(buffer_count=1))
    except (TypeError, AttributeError):
        return pl.BlockSpec(shape, index_map)


# --------------------- fused kernels (all weights resident in VMEM) ---------------------

def _mlp_res_proj_kernel(x_ref, wcat_ref, b1_ref, w2_ref, bres_ref, o_ref, *, out_p):
    """relu( relu(x@W1 + b1) @ W2 + (b2 + badj) + x@Wadj ), W1||Wadj fused in one MXU pass."""
    x = x_ref[...]
    hcat = jnp.dot(x, wcat_ref[...], preferred_element_type=jnp.float32)
    h_pre = hcat[:, :out_p]            # lane-aligned split (out_p % 128 == 0)
    identity = hcat[:, out_p:]
    h = jnp.maximum(h_pre + b1_ref[...], 0.0)                       # f32 epilogue
    y = jnp.dot(h.astype(w2_ref.dtype), w2_ref[...], preferred_element_type=jnp.float32)
    o_ref[...] = jnp.maximum(y + bres_ref[...] + identity, 0.0).astype(o_ref.dtype)


def _mlp_res_noproj_kernel(x_ref, w1_ref, b1_ref, w2_ref, b2_ref, o_ref):
    """relu( relu(x@W1 + b1) @ W2 + b2 + x ) -- identity residual, no extra matmul."""
    x = x_ref[...]
    h = jnp.maximum(
        jnp.dot(x, w1_ref[...], preferred_element_type=jnp.float32) + b1_ref[...], 0.0)
    y = jnp.dot(h.astype(w2_ref.dtype), w2_ref[...], preferred_element_type=jnp.float32)
    o_ref[...] = jnp.maximum(y + b2_ref[...] + x.astype(jnp.float32), 0.0).astype(o_ref.dtype)


# -------- streaming kernels (W1/W2 tiled over the hidden dim, f32 acc scratch) ----------

def _mlp_res_proj_stream_kernel(x_ref, w1_ref, b1_ref, w2_ref, wadj_ref, bres_ref,
                                o_ref, acc_ref):
    k = pl.program_id(1)
    x = x_ref[...]

    @pl.when(k == 0)
    def _():
        acc_ref[...] = (jnp.dot(x, wadj_ref[...], preferred_element_type=jnp.float32)
                        + bres_ref[...])

    h = jnp.maximum(
        jnp.dot(x, w1_ref[...], preferred_element_type=jnp.float32) + b1_ref[...], 0.0)
    acc_ref[...] += jnp.dot(h.astype(w2_ref.dtype), w2_ref[...],
                            preferred_element_type=jnp.float32)

    @pl.when(k == pl.num_programs(1) - 1)
    def _():
        o_ref[...] = jnp.maximum(acc_ref[...], 0.0).astype(o_ref.dtype)


def _mlp_res_noproj_stream_kernel(x_ref, w1_ref, b1_ref, w2_ref, bres_ref, o_ref, acc_ref):
    k = pl.program_id(1)
    x = x_ref[...]

    @pl.when(k == 0)
    def _():
        acc_ref[...] = x.astype(jnp.float32) + bres_ref[...]

    h = jnp.maximum(
        jnp.dot(x, w1_ref[...], preferred_element_type=jnp.float32) + b1_ref[...], 0.0)
    acc_ref[...] += jnp.dot(h.astype(w2_ref.dtype), w2_ref[...],
                            preferred_element_type=jnp.float32)

    @pl.when(k == pl.num_programs(1) - 1)
    def _():
        o_ref[...] = jnp.maximum(acc_ref[...], 0.0).astype(o_ref.dtype)


# ------------------------------------ wrappers -------------------------------------------

def prepare_mlp_block_residual_params(w1, b1, w2, b2, wadj=None, badj=None, *,
                                      compute_dtype=jnp.bfloat16):
    """One-time weight prep: pad to 128 lanes, fuse W1||Wadj, pre-sum b2+badj, cast.

    Call once (outside the hot path) and reuse the result across forward calls.
    """
    in_size, out_size = w1.shape
    has_proj = wadj is not None
    if not has_proj:
        assert in_size == out_size, (
            "Without a projection the residual requires input_size == output_size")
    in_p = _round_up(in_size, _LANE)
    out_p = _round_up(out_size, _LANE)

    w2_p = _pad2d(w2, out_p, out_p).astype(compute_dtype)
    b1_p = _pad2d(b1.reshape(1, -1).astype(jnp.float32), 1, out_p)
    if has_proj:
        w_first = jnp.concatenate(
            [_pad2d(w1, in_p, out_p), _pad2d(wadj, in_p, out_p)], axis=1
        ).astype(compute_dtype)
        bres = _pad2d((b2 + badj).reshape(1, -1).astype(jnp.float32), 1, out_p)
    else:
        w_first = _pad2d(w1, in_p, out_p).astype(compute_dtype)
        bres = _pad2d(b2.reshape(1, -1).astype(jnp.float32), 1, out_p)

    return dict(w_first=w_first, b1=b1_p, w2=w2_p, bres=bres,
                in_size=in_size, out_size=out_size, in_p=in_p, out_p=out_p,
                has_proj=has_proj, compute_dtype=jnp.dtype(compute_dtype))


def mlp_block_residual_prepared(x, params, *, block_m=256, block_k=512,
                                force_streaming=False):
    # TODO(synk): the PyTorch module accepts an arbitrary `activation`; this kernel
    # hard-codes the default ReLU.
    B = x.shape[0]
    in_size, out_size = params["in_size"], params["out_size"]
    in_p, out_p = params["in_p"], params["out_p"]
    has_proj = params["has_proj"]
    cdt = jnp.dtype(params["compute_dtype"])
    out_dtype = x.dtype
    c_bytes = cdt.itemsize
    o_bytes = jnp.dtype(out_dtype).itemsize
    assert x.shape[1] == in_size

    w_first = params["w_first"]
    b1_p, w2_p, bres = params["b1"], params["w2"], params["bres"]
    w_first_cols = w_first.shape[1]

    # Batch tile aligned to the packed-dtype sublane granularity (16 rows bf16, 32 8-bit).
    sub = max(_packed_sublane(cdt), _packed_sublane(out_dtype))
    tm = _round_up(min(block_m, _round_up(B, sub)), sub)
    b_p = _round_up(B, tm)
    n_tiles = b_p // tm
    if n_tiles == 1 and tm > sub:
        # Split into >= 2 batch tiles so dual-TensorCore chips (v7x) can shard the grid.
        half = _round_up(-(-tm // 2), sub)
        if half < tm:
            tm, b_p = half, _round_up(B, half)
            n_tiles = b_p // tm

    # Note: in the no-projection path the residual is added from the compute_dtype-cast x.
    x_p = _pad2d(x, b_p, in_p).astype(cdt)

    vmem_cap = _vmem_cap_bytes()
    # Resident-path VMEM: single-buffered weights, double-buffered x/out tiles, f32 temps.
    weight_bytes = (in_p * w_first_cols + out_p * out_p) * c_bytes + 2 * out_p * 4
    act_bytes = tm * in_p * c_bytes + tm * out_p * o_bytes
    tmp_bytes = tm * (w_first_cols + out_p) * 4
    resident_need = int((weight_bytes + 2 * act_bytes + tmp_bytes) * 1.15) + (2 << 20)
    use_streaming = force_streaming or resident_need > vmem_cap

    flops = 2 * b_p * (in_p * w_first_cols + out_p * out_p)

    if not use_streaming:
        const = lambda i: (0, 0)
        in_specs = [
            pl.BlockSpec((tm, in_p), lambda i: (i, 0)),                # x tile
            _resident_spec((in_p, w_first_cols), const),               # W1 (|| Wadj)
            _resident_spec((1, out_p), const),                         # b1
            _resident_spec((out_p, out_p), const),                     # W2
            _resident_spec((1, out_p), const),                         # b2 (+ badj)
        ]
        out_specs = pl.BlockSpec((tm, out_p), lambda i: (i, 0))
        kernel = (functools.partial(_mlp_res_proj_kernel, out_p=out_p)
                  if has_proj else _mlp_res_noproj_kernel)
        grid = (n_tiles,)
        dims = ("parallel",)
        scratch_shapes = ()
        args = (x_p, w_first, b1_p, w2_p, bres)
        bytes_accessed = int(b_p * in_p * c_bytes + weight_bytes + b_p * out_p * o_bytes)
        vmem_bytes = min(max(resident_need, 16 << 20), vmem_cap)
    else:
        # Stream W1 column-blocks / W2 row-blocks over the hidden dim; accumulate in an
        # f32 VMEM scratch with pl.when init/finalize.  Wadj stays resident.
        # TODO(synk): also stream Wadj for hidden sizes where a single (in_p, out_p)
        # matrix no longer fits VMEM.
        tk = min(_round_up(max(block_k, _LANE), _LANE), out_p)
        while out_p % tk:
            tk -= _LANE
        n_k = out_p // tk

        in_specs = [
            pl.BlockSpec((tm, in_p), lambda i, k: (i, 0)),             # x (resident over k)
            pl.BlockSpec((in_p, tk), lambda i, k: (0, k)),             # W1 column block
            pl.BlockSpec((1, tk), lambda i, k: (0, k)),                # b1 block
            pl.BlockSpec((tk, out_p), lambda i, k: (k, 0)),            # W2 row block
        ]
        args = [x_p, w_first, b1_p, w2_p]
        if has_proj:
            # Right half of the fused [W1 | Wadj] matrix == Wadj (block index (0, 1)).
            in_specs.append(_resident_spec((in_p, out_p), lambda i, k: (0, 1)))
            args.append(w_first)
            kernel = _mlp_res_proj_stream_kernel
        else:
            kernel = _mlp_res_noproj_stream_kernel
        in_specs.append(_resident_spec((1, out_p), lambda i, k: (0, 0)))  # b2 (+ badj)
        args.append(bres)
        args = tuple(args)

        out_specs = pl.BlockSpec((tm, out_p), lambda i, k: (i, 0))
        grid = (n_tiles, n_k)
        dims = ("parallel", "arbitrary")
        scratch_shapes = (pltpu.VMEM((tm, out_p), jnp.float32),)

        stream_need = ((in_p * out_p * c_bytes if has_proj else 0)
                       + 2 * (in_p * tk + tk * out_p) * c_bytes
                       + 2 * tm * in_p * c_bytes + 2 * tm * out_p * o_bytes
                       + tm * out_p * 4 + tm * tk * 4 + 4 * out_p * 4)
        vmem_bytes = min(max(int(stream_need * 1.15) + (2 << 20), 16 << 20), vmem_cap)
        bytes_accessed = int(b_p * in_p * c_bytes
                             + n_tiles * (in_p * out_p + out_p * out_p) * c_bytes
                             + (in_p * out_p * c_bytes if has_proj else 0)
                             + b_p * out_p * o_bytes)

    out_padded = pl.pallas_call(
        kernel,
        out_shape=jax.ShapeDtypeStruct((b_p, out_p), out_dtype),
        grid=grid,
        in_specs=in_specs,
        out_specs=out_specs,
        scratch_shapes=scratch_shapes,
        compiler_params=pltpu.CompilerParams(
            dimension_semantics=dims,
            vmem_limit_bytes=int(vmem_bytes)),
        cost_estimate=pl.CostEstimate(
            flops=int(flops), transcendentals=0, bytes_accessed=int(bytes_accessed)),
    )(*args)

    return out_padded[:B, :out_size]


def mlp_block_residual(x, w1, b1, w2, b2, wadj=None, badj=None, *,
                       compute_dtype=jnp.bfloat16, block_m=256, block_k=512,
                       force_streaming=False):
    """x: (B, input_size). Weights in (in, out) layout, biases (out,).

    If input_size == output_size, pass wadj/badj=None: the residual is added directly
    (no projection matmul), matching the PyTorch module.  bf16 MXU inputs by default
    with f32 accumulation and an f32 epilogue; use compute_dtype=jnp.float32 to opt out.
    """
    params = prepare_mlp_block_residual_params(
        w1, b1, w2, b2, wadj, badj, compute_dtype=compute_dtype)
    return mlp_block_residual_prepared(
        x, params, block_m=block_m, block_k=block_k, force_streaming=force_streaming)


# ------------------------------------ self test ------------------------------------------

def _init_linear(key, in_features, out_features, dtype=jnp.float32):
    """Deterministic init mimicking PyTorch nn.Linear default (uniform +-1/sqrt(in))."""
    kw, kb = jax.random.split(key)
    bound = 1.0 / (in_features ** 0.5)
    w = jax.random.uniform(kw, (in_features, out_features), dtype, -bound, bound)
    b = jax.random.uniform(kb, (out_features,), dtype, -bound, bound)
    return w, b


def _ref_fn(x, w1, b1, w2, b2, wadj=None, badj=None, *, cast=None):
    c = (lambda a: a.astype(cast).astype(jnp.float32)) if cast is not None else (lambda a: a)
    h = jnp.maximum(c(x) @ c(w1) + b1, 0.0)
    y = c(h) @ c(w2) + b2
    identity = (c(x) @ c(wadj) + badj) if wadj is not None else c(x)
    return jnp.maximum(y + identity, 0.0)


if __name__ == "__main__":
    key = jax.random.PRNGKey(0)
    k_x, k_l1, k_l2, k_adj = jax.random.split(key, 4)

    batch, input_size, output_size = 2, 16, 32
    x = jax.random.normal(k_x, (batch, input_size), dtype=jnp.float32)
    w1, b1 = _init_linear(k_l1, input_size, output_size)
    w2, b2 = _init_linear(k_l2, output_size, output_size)
    wadj, badj = _init_linear(k_adj, input_size, output_size)

    # 1) Projection path, default bf16 MXU inputs; weights prepared once, reused twice.
    params = prepare_mlp_block_residual_params(w1, b1, w2, b2, wadj, badj)
    out_bf16 = jax.block_until_ready(mlp_block_residual_prepared(x, params))
    _ = jax.block_until_ready(mlp_block_residual_prepared(x + 1.0, params))
    ref_bf16 = _ref_fn(x, w1, b1, w2, b2, wadj, badj, cast=jnp.bfloat16)
    assert out_bf16.shape == (batch, output_size)
    assert jnp.allclose(out_bf16, ref_bf16, atol=2e-2, rtol=2e-2), "proj/bf16 mismatch"

    # 2) Identity-residual path (input_size == output_size): no projection matmul at all.
    k_x2, k_l1b, k_l2b = jax.random.split(jax.random.PRNGKey(1), 3)
    x2 = jax.random.normal(k_x2, (batch, output_size), dtype=jnp.float32)
    w1b, b1b = _init_linear(k_l1b, output_size, output_size)
    w2b, b2b = _init_linear(k_l2b, output_size, output_size)
    out_bf16_id = jax.block_until_ready(mlp_block_residual(x2, w1b, b1b, w2b, b2b))
    ref_bf16_id = _ref_fn(x2, w1b, b1b, w2b, b2b, cast=jnp.bfloat16)
    assert jnp.allclose(out_bf16_id, ref_bf16_id, atol=2e-2, rtol=2e-2), "noproj/bf16 mismatch"

    # 3) Full f32 MXU path.
    out_f32 = jax.block_until_ready(
        mlp_block_residual(x, w1, b1, w2, b2, wadj, badj, compute_dtype=jnp.float32))
    ref_f32 = _ref_fn(x, w1, b1, w2, b2, wadj, badj)
    assert jnp.allclose(out_f32, ref_f32, atol=5e-3, rtol=5e-3), "proj/f32 mismatch"

    # 4) Forced hidden-streaming fallback: multi-tile batch grid + 2 hidden blocks.
    k_x3, k_l1c, k_l2c, k_adjc = jax.random.split(jax.random.PRNGKey(2), 4)
    b3, in3, out3 = 40, 48, 160
    x3 = jax.random.normal(k_x3, (b3, in3), dtype=jnp.float32)
    w1c, b1c = _init_linear(k_l1c, in3, out3)
    w2c, b2c = _init_linear(k_l2c, out3, out3)
    wadjc, badjc = _init_linear(k_adjc, in3, out3)
    out_stream = jax.block_until_ready(
        mlp_block_residual(x3, w1c, b1c, w2c, b2c, wadjc, badjc,
                           compute_dtype=jnp.float32, block_k=128, force_streaming=True))
    ref_stream = _ref_fn(x3, w1c, b1c, w2c, b2c, wadjc, badjc)
    assert jnp.allclose(out_stream, ref_stream, atol=5e-3, rtol=5e-3), "proj/stream mismatch"

    # 5) Streaming fallback, identity-residual variant.
    out_stream_id = jax.block_until_ready(
        mlp_block_residual(x2, w1b, b1b, w2b, b2b, compute_dtype=jnp.float32,
                           block_k=128, force_streaming=True))
    ref_stream_id = _ref_fn(x2, w1b, b1b, w2b, b2b)
    assert jnp.allclose(out_stream_id, ref_stream_id, atol=5e-3, rtol=5e-3), "noproj/stream mismatch"

    print("KERNEL_OK")
</pallas_src>

<mosaic_0001>
module attributes {stable_mosaic.version = 11 : i64} {
  func.func @_mlp_res_proj_kernel(%arg0: i32, %arg1: memref<16x128xbf16, #tpu.memory_space<vmem>>, %arg2: memref<128x256xbf16, #tpu.memory_space<vmem>>, %arg3: memref<1x128xf32, #tpu.memory_space<vmem>>, %arg4: memref<128x128xbf16, #tpu.memory_space<vmem>>, %arg5: memref<1x128xf32, #tpu.memory_space<vmem>>, %arg6: memref<16x128xf32, #tpu.memory_space<vmem>>) attributes {dimension_semantics = [#tpu.dimension_semantics<parallel>], iteration_bounds = array<i64: 1>, scalar_prefetch = 0 : i64, scratch_operands = 0 : i64, tpu.core_type = #tpu.core_type<tc>, window_params = [{transform_indices = @transform_0, window_bounds = array<i64: 16, 128>}, {pipeline_mode = #tpu.pipeline_mode<synchronous>, transform_indices = @transform_1, window_bounds = array<i64: 128, 256>}, {pipeline_mode = #tpu.pipeline_mode<synchronous>, transform_indices = @transform_2, window_bounds = array<i64: 1, 128>}, {pipeline_mode = #tpu.pipeline_mode<synchronous>, transform_indices = @transform_3, window_bounds = array<i64: 128, 128>}, {pipeline_mode = #tpu.pipeline_mode<synchronous>, transform_indices = @transform_4, window_bounds = array<i64: 1, 128>}, {transform_indices = @transform_5, window_bounds = array<i64: 16, 128>}]} {
    %c0 = arith.constant 0 : index
    %c0_0 = arith.constant 0 : index
    %0 = vector.load %arg1[%c0, %c0_0] : memref<16x128xbf16, #tpu.memory_space<vmem>>, vector<16x128xbf16>
    %c0_1 = arith.constant 0 : index
    %c0_2 = arith.constant 0 : index
    %1 = vector.load %arg2[%c0_1, %c0_2] : memref<128x256xbf16, #tpu.memory_space<vmem>>, vector<128x256xbf16>
    %cst = arith.constant dense<0.000000e+00> : vector<16x256xf32>
    %2 = tpu.matmul %0, %1, %cst {dimension_numbers = #tpu.dot_dimension_numbers<[1], [0], [0], [1], [0, 0, 1, 1], [], []>} : vector<16x128xbf16>, vector<128x256xbf16>, vector<16x256xf32> -> vector<16x256xf32>
    %3 = vector.extract_strided_slice %2 {offsets = [0, 0], sizes = [16, 128], strides = [1, 1]} : vector<16x256xf32> to vector<16x128xf32>
    %4 = vector.extract_strided_slice %2 {offsets = [0, 128], sizes = [16, 128], strides = [1, 1]} : vector<16x256xf32> to vector<16x128xf32>
    %c0_3 = arith.constant 0 : index
    %c0_4 = arith.constant 0 : index
    %5 = vector.load %arg3[%c0_3, %c0_4] : memref<1x128xf32, #tpu.memory_space<vmem>>, vector<1x128xf32>
    %6 = vector.broadcast %5 : vector<1x128xf32> to vector<16x128xf32>
    %7 = arith.addf %3, %6 : vector<16x128xf32>
    %cst_5 = arith.constant 0.000000e+00 : f32
    %8 = vector.broadcast %cst_5 : f32 to vector<16x128xf32>
    %9 = arith.maximumf %7, %8 : vector<16x128xf32>
    %10 = arith.truncf %9 : vector<16x128xf32> to vector<16x128xbf16>
    %c0_6 = arith.constant 0 : index
    %c0_7 = arith.constant 0 : index
    %11 = vector.load %arg4[%c0_6, %c0_7] : memref<128x128xbf16, #tpu.memory_space<vmem>>, vector<128x128xbf16>
    %cst_8 = arith.constant dense<0.000000e+00> : vector<16x128xf32>
    %12 = tpu.matmul %10, %11, %cst_8 {dimension_numbers = #tpu.dot_dimension_numbers<[1], [0], [0], [1], [0, 0, 1, 1], [], []>} : vector<16x128xbf16>, vector<128x128xbf16>, vector<16x128xf32> -> vector<16x128xf32>
    %c0_9 = arith.constant 0 : index
    %c0_10 = arith.constant 0 : index
    %13 = vector.load %arg5[%c0_9, %c0_10] : memref<1x128xf32, #tpu.memory_space<vmem>>, vector<1x128xf32>
    %14 = vector.broadcast %13 : vector<1x128xf32> to vector<16x128xf32>
    %15 = arith.addf %12, %14 : vector<16x128xf32>
    %16 = arith.addf %15, %4 : vector<16x128xf32>
    %cst_11 = arith.constant 0.000000e+00 : f32
    %17 = vector.broadcast %cst_11 : f32 to vector<16x128xf32>
    %18 = arith.maximumf %16, %17 : vector<16x128xf32>
    %c0_12 = arith.constant 0 : index
    %c0_13 = arith.constant 0 : index
    %19 = vector.load %arg6[%c0_12, %c0_13] : memref<16x128xf32, #tpu.memory_space<vmem>>, vector<16x128xf32>
    tpu.vector_store %arg6[%c0_12, %c0_13], %18 {strides = array<i32>} : memref<16x128xf32, #tpu.memory_space<vmem>>, vector<16x128xf32>,
    return
  }
  func.func @transform_0(%arg0: i32) -> (i32, i32) {
    %c0_i32 = arith.constant 0 : i32
    %c0_i32_0 = arith.constant 0 : i32
    return %arg0, %c0_i32 : i32, i32
  }
  func.func @transform_1(%arg0: i32) -> (i32, i32) {
    %c0_i32 = arith.constant 0 : i32
    %c0_i32_0 = arith.constant 0 : i32
    %c0_i32_1 = arith.constant 0 : i32
    return %c0_i32, %c0_i32_0 : i32, i32
  }
  func.func @transform_2(%arg0: i32) -> (i32, i32) {
    %c0_i32 = arith.constant 0 : i32
    %c0_i32_0 = arith.constant 0 : i32
    %c0_i32_1 = arith.constant 0 : i32
    return %c0_i32, %c0_i32_0 : i32, i32
  }
  func.func @transform_3(%arg0: i32) -> (i32, i32) {
    %c0_i32 = arith.constant 0 : i32
    %c0_i32_0 = arith.constant 0 : i32
    %c0_i32_1 = arith.constant 0 : i32
    return %c0_i32, %c0_i32_0 : i32, i32
  }
  func.func @transform_4(%arg0: i32) -> (i32, i32) {
    %c0_i32 = arith.constant 0 : i32
    %c0_i32_0 = arith.constant 0 : i32
    %c0_i32_1 = arith.constant 0 : i32
    return %c0_i32, %c0_i32_0 : i32, i32
  }
  func.func @transform_5(%arg0: i32) -> (i32, i32) {
    %c0_i32 = arith.constant 0 : i32
    %c0_i32_0 = arith.constant 0 : i32
    return %arg0, %c0_i32 : i32, i32
  }
}

</mosaic_0001>

<bundles_post_ra>
// kernel: tpu_custom_call.1
= control target key start
LH: loop header
LB: loop body
LE: loop exit
PB: predicated region body
PF: predicated region fallthrough
CT: control target
= control target key end

     0   :  { %10 = vsyncpa [#allocation3], 0  ;;  %s653_s0 = inlined_call_operand.hbm [shape: bf16[16,128], index: 0, kind: input, shape index: {}]   ;;  %s654_s1 = inlined_call_operand.hbm [shape: bf16[128,256], index: 1, kind: input, shape index: {}]   ;;  %s655_s2 = inlined_call_operand.vmem [shape: f32[1,128], index: 2, kind: input, shape index: {}]   ;;  %s656_s3 = inlined_call_operand.hbm [shape: bf16[128,128], index: 3, kind: input, shape index: {}]   ;;  %s657_s4 = inlined_call_operand.vmem [shape: f32[1,128], index: 4, kind: input, shape index: {}]   ;;  %s658_s5 = inlined_call_operand.hbm [shape: f32[16,128], index: 5, kind: output, shape index: {}]  }
   0x1   :  { %11 = vsyncpa [#allocation6], 0 }
   0x2   :  { %12 = vsyncpa [#allocation4], 0  ;;  %s552_s18 = smov [#allocation5]   ;;  %s458_s22 = scalar_lea.hbm %s654_s1, 2048 }
   0x3   :  { %s30_s19 = sshll.u32 %s552_s18, 4  ;;  %p459_p0 = scmp.ne.s32.totalorder %s654_s1, %s458_s22  ;;  %s31_s19 = int_to_ptr.vmem [resolvable:$true] %s30_s19 }
   0x4   :  { %p462_p1 = scmp.lt.u32.totalorder %s458_s22, %s654_s1 }
   0x6   :  { %p464_p2 = pnand %p462_p1, %p459_p0 }
   0x8   :  { %467 = shalt.err (!%p464_p2)
}
   0x9   :  { %s468_s27 = scalar_lea.vmem %s31_s19, 2048  ;;  %p473_p4 = scmp.lt.s32.totalorder %s31_s19, %s31_s19 }
   0xa   :  { %p469_p3 = scmp.ne.s32.totalorder %s31_s19, %s468_s27  ;;  %p474_p5 = scmp.lt.s32.totalorder %s468_s27, %s468_s27 }
   0xc   :  { %p475_p6 = por %p474_p5, %p473_p4 }
   0xe   :  { %p476_p7 = pnand %p475_p6, %p469_p3 }
  0x10   :  { %479 = shalt.err (!%p476_p7)
}
  0x11   :  { %s553_s28 = smov 128   ;;  %s554_s29 = smov 8  }
  0x12   :  { %36 = dma.hbm_to_vmem [thread:$0]  %s654_s1, 2048, %s31_s19, [#allocation6], %s553_s28, %s553_s28, %s554_s29  }
  0x13   :  { %s555_s7 = smov [#allocation2]   ;;  %s480_s11 = scalar_lea.hbm %s653_s0, 128 }
  0x14   :  { %s18_s8 = sshll.u32 %s555_s7, 4  ;;  %p481_p8 = scmp.ne.s32.totalorder %s653_s0, %s480_s11  ;;  %s19_s8 = int_to_ptr.vmem [resolvable:$true] %s18_s8 }
  0x15   :  { %p484_p9 = scmp.lt.u32.totalorder %s480_s11, %s653_s0 }
  0x17   :  { %p486_p10 = pnand %p484_p9, %p481_p8 }
  0x19   :  { %489 = shalt.err (!%p486_p10)
}
  0x1a   :  { %s490_s16 = scalar_lea.vmem %s19_s8, 128  ;;  %p495_p12 = scmp.lt.s32.totalorder %s19_s8, %s19_s8 }
  0x1b   :  { %p491_p11 = scmp.ne.s32.totalorder %s19_s8, %s490_s16  ;;  %p496_p13 = scmp.lt.s32.totalorder %s490_s16, %s490_s16 }
  0x1d   :  { %p497_p0 = por %p496_p13, %p495_p12 }
  0x1f   :  { %p498_p1 = pnand %p497_p0, %p491_p11 }
  0x21   :  { %501 = shalt.err (!%p498_p1)
}
  0x22   :  { %s556_s1 = smov 64   ;;  %s557_s17 = smov 4  }
  0x23   :  { %24 = dma.hbm_to_vmem [thread:$0]  %s653_s0, 128, %s19_s8, [#allocation3], %s556_s1, %s556_s1, %s557_s17  }
  0x24   :  { %s558_s20 = smov [#allocation7]   ;;  %s502_s24 = scalar_lea.hbm %s656_s3, 1024 }
  0x25   :  { %s44_s21 = sshll.u32 %s558_s20, 4  ;;  %p503_p2 = scmp.ne.s32.totalorder %s656_s3, %s502_s24  ;;  %s45_s21 = int_to_ptr.vmem [resolvable:$true] %s44_s21 }
  0x26   :  { %p506_p3 = scmp.lt.u32.totalorder %s502_s24, %s656_s3 }
  0x28   :  { %p508_p4 = pnand %p506_p3, %p503_p2 }
  0x2a   :  { %511 = shalt.err (!%p508_p4)
}
  0x2b   :  { %s512_s6 = scalar_lea.vmem %s45_s21, 1024  ;;  %p517_p6 = scmp.lt.s32.totalorder %s45_s21, %s45_s21 }
  0x2c   :  { %p513_p5 = scmp.ne.s32.totalorder %s45_s21, %s512_s6  ;;  %p518_p7 = scmp.lt.s32.totalorder %s512_s6, %s512_s6 }
  0x2e   :  { %p519_p8 = por %p518_p7, %p517_p6 }
  0x30   :  { %p520_p9 = pnand %p519_p8, %p513_p5 }
  0x32   :  { %523 = shalt.err (!%p520_p9)
}
  0x33   :  { %50 = dma.hbm_to_vmem [thread:$0]  %s656_s3, 1024, %s45_s21, [#allocation6], %s556_s1, %s556_s1, %s557_s17  }
  0x34   :  { %546 = dma.done.wait [#allocation3], 128  }
  0x35   :  { %547 = vsyncadd [#allocation3], 4294967168 }
  0x36   :  { %548 = dma.done.wait [#allocation6], 3072  }
  0x37   :  { %549 = vsyncadd [#allocation6], 4294964224  ;;  %v559_v0 = vmov 0   ;;  %v560_v1 = vmov 0.0   ;;  %v425_v2 = vld [vmem:[#allocation5 + $0x4] ss:$8 sps:$4 sm:$0xff]  }
  0x38   :  { %199 = vmatprep.mubr.bf16.mxu0 %v559_v0  ;;  %394 = vmatprep.subr.bf16.mxu1 %v560_v1  ;;  %v427_v3 = vld [vmem:[#allocation5] ss:$8 sps:$4 sm:$0xff]   ;;  %v428_v4 = vld [vmem:[#allocation5 + $0x14] ss:$8 sps:$4 sm:$0xff]   ;;  %v430_v5 = vld [vmem:[#allocation5 + $0x10] ss:$8 sps:$4 sm:$0xff]  }
  0x39   :  { %167 = vmatprep.subr.bf16.mxu0 %v425_v2  ;;  %v431_v6 = vld [vmem:[#allocation5 + $0x24] ss:$8 sps:$4 sm:$0xff]   ;;  %v433_v7 = vld [vmem:[#allocation5 + $0x20] ss:$8 sps:$4 sm:$0xff]   ;;  %v434_v8 = vld [vmem:[#allocation5 + $0x34] ss:$8 sps:$4 sm:$0xff]  }
  0x3a   :  { %168 = vmatpush1.bf16.msra.mxu0 %v427_v3  ;;  %v436_v9 = vld [vmem:[#allocation5 + $0x30] ss:$8 sps:$4 sm:$0xff]   ;;  %v437_v10 = vld [vmem:[#allocation5 + $0x44] ss:$8 sps:$4 sm:$0xff]   ;;  %v439_v13 = vld [vmem:[#allocation5 + $0x40] ss:$8 sps:$4 sm:$0xff]  }
  0x3b   :  { %169 = vmatprep.subr.bf16.mxu0 %v428_v4  ;;  %v450_v11 = vld [vmem:[#allocation7] sm:$0xff]   ;;  %v451_v12 = vld [vmem:[#allocation7 + $0x8] sm:$0xff]   ;;  %v440_v14 = vld [vmem:[#allocation5 + $0x54] ss:$8 sps:$4 sm:$0xff]   ;;  %vm561_vm0 = vmmov 0  }
  0x3c   :  { %395 = vmatpush3.bf16.msra.mxu1 %v450_v11  ;;  %v452_v15 = vld [vmem:[#allocation7 + $0x10] sm:$0xff]   ;;  %v443_v17 = vld [vmem:[#allocation5 + $0x64] ss:$8 sps:$4 sm:$0xff]   ;;  %v453_v18 = vld [vmem:[#allocation7 + $0x18] sm:$0xff]   ;;  %410 = vmatprep.mubr.msk.bf16.mxu1 %vm561_vm0, %v560_v1 }
  0x3d   :  { %396 = vmatprep.subr.bf16.mxu1 %v560_v1  ;;  %v442_v16 = vld [vmem:[#allocation5 + $0x50] ss:$8 sps:$4 sm:$0xff]   ;;  %v445_v19 = vld [vmem:[#allocation5 + $0x60] ss:$8 sps:$4 sm:$0xff]   ;;  %v446_v20 = vld [vmem:[#allocation5 + $0x74] ss:$8 sps:$4 sm:$0xff]  }
  0x3e   :  { %170 = vmatpush1.bf16.msra.mxu0 %v430_v5  ;;  %v454_v21 = vld [vmem:[#allocation7 + $0x20] sm:$0xff]   ;;  %v448_v22 = vld [vmem:[#allocation5 + $0x70] ss:$8 sps:$4 sm:$0xff]   ;;  %v455_v24 = vld [vmem:[#allocation7 + $0x28] sm:$0xff]  }
  0x3f   :  { %171 = vmatprep.subr.bf16.mxu0 %v431_v6  ;;  %v449_v23 = vld [vmem:[#allocation2] sm:$0xff]   ;;  %v456_v25 = vld [vmem:[#allocation7 + $0x30] sm:$0xff]  }
  0x40   :  { %397 = vmatpush3.bf16.msra.mxu1 %v451_v12  ;;  %v457_v26 = vld [vmem:[#allocation7 + $0x38] sm:$0xff]  }
  0x41   :  { %398 = vmatprep.subr.bf16.mxu1 %v560_v1  ;;  %v375_v27 = vld [vmem:[%s655_s2] ss:$0 sm:$0xff]  ;;  %s562_s2 = smov [#allocation8]  }
  0x42   :  { %172 = vmatpush1.bf16.msra.mxu0 %v433_v7  ;;  %v376_v37 = vld [vmem:[%s657_s4] ss:$0 sm:$0xff]  ;;  %s345_s11 = sshll.u32 %s562_s2, 4  ;;  %s346_s11 = int_to_ptr.vmem [resolvable:$true] %s345_s11 }
  0x43   :  { %173 = vmatprep.subr.bf16.mxu0 %v434_v8  ;;  %s524_s12 = scalar_lea.vmem %s346_s11, 256  ;;  %p529_p11 = scmp.lt.s32.totalorder %s346_s11, %s346_s11 }
  0x44   :  { %399 = vmatpush3.bf16.msra.mxu1 %v452_v15  ;;  %p525_p10 = scmp.ne.s32.totalorder %s346_s11, %s524_s12  ;;  %p530_p12 = scmp.lt.s32.totalorder %s524_s12, %s524_s12 }
  0x45   :  { %400 = vmatprep.subr.bf16.mxu1 %v560_v1 }
  0x46   :  { %174 = vmatpush1.bf16.msra.mxu0 %v436_v9  ;;  %p531_p13 = por %p530_p12, %p529_p11 }
  0x47   :  { %175 = vmatprep.subr.bf16.mxu0 %v437_v10 }
  0x48   :  { %401 = vmatpush3.bf16.msra.mxu1 %v453_v18  ;;  %p532_p0 = pnand %p531_p13, %p525_p10 }
  0x49   :  { %402 = vmatprep.subr.bf16.mxu1 %v560_v1 }
  0x4a   :  { %176 = vmatpush1.bf16.msra.mxu0 %v439_v13 }
  0x4b   :  { %177 = vmatprep.subr.bf16.mxu0 %v440_v14 }
  0x4c   :  { %403 = vmatpush3.bf16.msra.mxu1 %v454_v21 }
  0x4d   :  { %404 = vmatprep.subr.bf16.mxu1 %v560_v1 }
  0x4e   :  { %178 = vmatpush1.bf16.msra.mxu0 %v442_v16 }
  0x4f   :  { %179 = vmatprep.subr.bf16.mxu0 %v443_v17 }
  0x50   :  { %405 = vmatpush3.bf16.msra.mxu1 %v455_v24 }
  0x51   :  { %406 = vmatprep.subr.bf16.mxu1 %v560_v1 }
  0x52   :  { %180 = vmatpush1.bf16.msra.mxu0 %v445_v19 }
  0x53   :  { %181 = vmatprep.subr.bf16.mxu0 %v446_v20 }
  0x54   :  { %407 = vmatpush3.bf16.msra.mxu1 %v456_v25 }
  0x55   :  { %408 = vmatprep.subr.bf16.mxu1 %v560_v1 }
  0x56   :  { %182 = vmatpush1.bf16.msra.mxu0 %v448_v22 }
  0x58   :  { %409 = vmatpush3.bf16.msra.mxu1 %v457_v26 }
  0x59   :  { %200 = vmatmul.mubr.bf16.vlgmr.msra.gmra.mrb[0].mxu0 %v449_v23 }
 0x12c   :  { %v201_v28 = vpop.f32.mrb[0].mxu0 }
 0x12d   :  { %v217_v29 = vadd.f32 %v375_v27, %v201_v28  ;;  %v203_v30 = vpop.f32.mrb[1].mxu0 }
 0x12e   :  { %v205_v31 = vpop.f32.mrb[2].mxu0 }
 0x12f   :  { %v218_v32 = vadd.f32 %v375_v27, %v205_v31  ;;  %v207_v33 = vpop.f32.mrb[3].mxu0  ;;  %v219_v34 = vmax.f32 %v217_v29, 0.0 }
 0x131   :  { %v220_v35 = vmax.f32 %v218_v32, 0.0 }
 0x133   :  { %v221_v36 = vpack.c.bf16 %v220_v35, %v219_v34 }
 0x135   :  { %411 = vmatmul.mubr.bf16.vlgmr.msra.gmra.mrb[0].mxu1 %v221_v36 }
 0x208   :  { %v327_v38 = vpop.f32.mrb[0].mxu1 }
 0x209   :  { %v328_v39 = vadd.f32 %v376_v37, %v327_v38  ;;  %v412_v40 = vpop.f32.mrb[1].mxu1 }
 0x20a   :  { %v330_v41 = vpop.f32.mrb[2].mxu1 }
 0x20b   :  { %v334_v42 = vadd.f32 %v328_v39, %v203_v30  ;;  %v331_v43 = vadd.f32 %v376_v37, %v330_v41  ;;  %v413_v44 = vpop.f32.mrb[3].mxu1 }
 0x20d   :  { %v336_v45 = vmax.f32 %v334_v42, 0.0  ;;  %v335_v46 = vadd.f32 %v331_v43, %v207_v33 }
 0x20f   :  { %338 = vst [vmem:[#allocation8] sm:$0xff] %v336_v45  ;;  %v337_v47 = vmax.f32 %v335_v46, 0.0 }
 0x211   :  { %339 = vst [vmem:[#allocation8 + $0x8] sm:$0xff] %v337_v47 }
 0x212   :  { %535 = shalt.err (!%p532_p0)
}
 0x213   :  { %s536_s14 = scalar_lea.hbm %s658_s5, 256 }
 0x214   :  { %p537_p1 = scmp.ne.s32.totalorder %s658_s5, %s536_s14  ;;  %p540_p2 = scmp.lt.u32.totalorder %s536_s14, %s658_s5 }
 0x216   :  { %p542_p3 = pnand %p540_p2, %p537_p1 }
 0x218   :  { %545 = shalt.err (!%p542_p3)
}
 0x219   :  { %351 = dma.vmem_to_hbm [thread:$0]  %s346_s11, 256, %s658_s5, [#allocation4], %s553_s28, %s553_s28, %s554_s29  }
 0x21a   :  { %550 = dma.done.wait [#allocation4], 256  }
 0x21b   :  { %551 = vsyncadd [#allocation4], 4294967040 }
 0x21c   :  { %355 = vsyncpa [#allocation3], 1 }
 0x21d   :  { %356 = vsyncpa [#allocation6], 1 }
 0x21e   :  { %357 = vsyncpa [#allocation4], 1 }

</bundles_post_ra>
